<compile_context>
chip_gen: v7x
topology: tpu7x:2x2x1
jax: 0.10.0
libtpu: 0.0.40
codegen_flags: <defaults>
</compile_context>

<pallas_src>
import functools

import jax
import jax.numpy as jnp
import numpy as np
from jax.experimental import pallas as pl
from jax.experimental.pallas import tpu as pltpu


def _loss_tree3_kernel(pf_ref, pc_ref, tgt_ref, pt_ref, tt_ref,   # inputs (VMEM tiles)
                       out_ref,                                    # output (1,) SMEM
                       acc_ref,                                    # scratch SMEM (3,) f32
                       *, tile_n, n_rows, n_thresh_elems,
                       w_feat, w_class, w_thresh, needs_mask):
    pid = pl.program_id(0)

    # ---- init accumulators on the first tile -------------------------------
    @pl.when(pid == 0)
    def _():
        acc_ref[0] = 0.0
        acc_ref[1] = 0.0
        acc_ref[2] = 0.0

    # ---- row-validity mask (only emitted when N % TILE_N != 0) -------------
    if needs_mask:
        rows = (jax.lax.broadcasted_iota(jnp.int32, (tile_n, 1), 0)
                + pid * tile_n)
        valid = rows < n_rows                                   # [tile_n, 1] bool
    else:
        valid = None

    tgt = tgt_ref[...]                                          # [tile_n, 2] int32

    # ---- cross-entropy partial sum over this tile ---------------------------
    def ce_tile_sum(logits_ref, labels):                        # labels: [tile_n, 1]
        logits = logits_ref[...].astype(jnp.float32)            # upcast on load
        m = jnp.max(logits, axis=-1, keepdims=True)
        lse = jnp.log(jnp.sum(jnp.exp(logits - m), axis=-1, keepdims=True)) + m
        cols = jax.lax.broadcasted_iota(jnp.int32, logits.shape, 1)
        picked = jnp.sum(jnp.where(cols == labels, logits, 0.0),
                         axis=-1, keepdims=True)                # one-hot gather
        per_row = lse - picked                                  # [tile_n, 1]
        if valid is not None:
            per_row = jnp.where(valid, per_row, 0.0)
        return jnp.sum(per_row)

    acc_ref[0] += ce_tile_sum(pf_ref, tgt[:, 0:1])
    acc_ref[1] += ce_tile_sum(pc_ref, tgt[:, 1:2])

    # ---- MSE partial sum over this tile -------------------------------------
    diff = pt_ref[...].astype(jnp.float32) - tt_ref[...].astype(jnp.float32)
    if valid is not None:
        diff = jnp.where(valid, diff, 0.0)
    acc_ref[2] += jnp.sum(diff * diff)

    # ---- finalize: divide by counts, weighted combine -----------------------
    @pl.when(pid == pl.num_programs(0) - 1)
    def _():
        inv_n = 1.0 / float(n_rows)
        out_ref[0] = (w_feat * acc_ref[0] * inv_n
                      + w_class * acc_ref[1] * inv_n
                      + w_thresh * acc_ref[2] * (1.0 / float(n_thresh_elems)))


def loss_tree3_weights(pred, target,
                       weight_feat=1.0, weight_class=1.0, weight_thresh=1.0,
                       tile_n=128):
    """pred   = (logits_feat [N,Cf], logits_class [N,Cc], thresh [N,D])
       target = (labels_feat [N] int, labels_class [N] int, thresh [N,D])"""
    pf, pc, pt = pred
    tf_, tc, tt = target

    n, cf = pf.shape
    _, cc = pc.shape
    _, d = pt.shape

    # Tile size: a multiple of 8 (sublane), or the whole batch if it is small.
    if n <= tile_n:
        tile_n = n
    else:
        tile_n = max(8, (tile_n // 8) * 8)
    num_tiles = pl.cdiv(n, tile_n)
    needs_mask = (num_tiles * tile_n != n)

    # Merge the two integer label vectors into a single (N, 2) int32 operand.
    labels = jnp.stack([tf_.astype(jnp.int32), tc.astype(jnp.int32)], axis=-1)

    kernel = functools.partial(
        _loss_tree3_kernel,
        tile_n=tile_n, n_rows=n, n_thresh_elems=n * d,
        w_feat=float(weight_feat), w_class=float(weight_class),
        w_thresh=float(weight_thresh), needs_mask=needs_mask)

    grid_spec = pltpu.PrefetchScalarGridSpec(
        num_scalar_prefetch=0,
        grid=(num_tiles,),
        in_specs=[
            pl.BlockSpec((tile_n, cf), lambda i: (i, 0)),   # feat logits
            pl.BlockSpec((tile_n, cc), lambda i: (i, 0)),   # class logits
            pl.BlockSpec((tile_n, 2), lambda i: (i, 0)),    # stacked int labels
            pl.BlockSpec((tile_n, d), lambda i: (i, 0)),    # thresh pred
            pl.BlockSpec((tile_n, d), lambda i: (i, 0)),    # thresh target
        ],
        out_specs=pl.BlockSpec((1,), lambda i: (0,),
                               memory_space=pltpu.MemorySpace.SMEM),
        scratch_shapes=[pltpu.SMEM((3,), jnp.float32)],
    )

    return pl.pallas_call(
        kernel,
        out_shape=jax.ShapeDtypeStruct((1,), jnp.float32),
        grid_spec=grid_spec,
        compiler_params=pltpu.CompilerParams(
            dimension_semantics=("arbitrary",)),   # accumulator carried over grid
    )(pf, pc, labels, pt, tt)


def _reference(pred, target, wf, wc, wt):
    """Pure-JAX reference mirroring torch.nn semantics."""
    def ce(logits, lab):
        logp = jax.nn.log_softmax(logits.astype(jnp.float32), axis=-1)
        return -jnp.mean(jnp.take_along_axis(
            logp, lab[:, None].astype(jnp.int32), axis=-1))
    lf = ce(pred[0], target[0])
    lc = ce(pred[1], target[1])
    lt = jnp.mean((pred[2].astype(jnp.float32) - target[2].astype(jnp.float32)) ** 2)
    return wf * lf + wc * lc + wt * lt


if __name__ == "__main__":
    key = jax.random.PRNGKey(0)
    k1, k2, k3, k4, k5, k6 = jax.random.split(key, 6)

    N, Cf, Cc, D = 64, 16, 8, 16

    pred_feat = jax.random.normal(k1, (N, Cf), dtype=jnp.float32)
    pred_class = jax.random.normal(k2, (N, Cc), dtype=jnp.float32)
    pred_thresh = jax.random.normal(k3, (N, D), dtype=jnp.float32)

    tgt_feat = jax.random.randint(k4, (N,), 0, Cf, dtype=jnp.int32)
    tgt_class = jax.random.randint(k5, (N,), 0, Cc, dtype=jnp.int32)
    tgt_thresh = jax.random.normal(k6, (N, D), dtype=jnp.float32)

    # Module __init__ weights (non-trivial to exercise the weighted combine).
    wf, wc, wt = 0.7, 1.3, 2.0

    pred = (pred_feat, pred_class, pred_thresh)
    target = (tgt_feat, tgt_class, tgt_thresh)

    # tile_n=16 -> 4 grid steps; exercises init / accumulate / finalize path.
    out = loss_tree3_weights(pred, target, wf, wc, wt, tile_n=16)
    out = jax.block_until_ready(out)

    ref = _reference(pred, target, wf, wc, wt)
    assert out.shape == (1,)
    assert np.allclose(np.asarray(out)[0], float(ref), rtol=1e-5, atol=1e-5), (out, ref)

    print("KERNEL_OK")
</pallas_src>

<mosaic_0001>
module attributes {stable_mosaic.version = 11 : i64} {
  func.func @_loss_tree3_kernel(%arg0: i32, %arg1: memref<16x16xf32, #tpu.memory_space<vmem>>, %arg2: memref<16x8xf32, #tpu.memory_space<vmem>>, %arg3: memref<16x2xi32, #tpu.memory_space<vmem>>, %arg4: memref<16x16xf32, #tpu.memory_space<vmem>>, %arg5: memref<16x16xf32, #tpu.memory_space<vmem>>, %arg6: memref<1xf32, #tpu.memory_space<smem>>, %arg7: memref<3xf32, #tpu.memory_space<smem>>) attributes {dimension_semantics = [#tpu.dimension_semantics<arbitrary>], iteration_bounds = array<i64: 4>, scalar_prefetch = 0 : i64, scratch_operands = 1 : i64, tpu.core_type = #tpu.core_type<tc>, window_params = [{transform_indices = @transform_0, window_bounds = array<i64: 16, 16>}, {transform_indices = @transform_1, window_bounds = array<i64: 16, 8>}, {transform_indices = @transform_2, window_bounds = array<i64: 16, 2>}, {transform_indices = @transform_3, window_bounds = array<i64: 16, 16>}, {transform_indices = @transform_4, window_bounds = array<i64: 16, 16>}, {transform_indices = @transform_5, window_bounds = array<i64: 1>}]} {
    %c0_i32 = arith.constant 0 : i32
    %0 = arith.cmpi eq, %arg0, %c0_i32 : i32
    %1 = arith.extui %0 : i1 to i32
    %c0_i32_0 = arith.constant 0 : i32
    %2 = arith.cmpi ne, %1, %c0_i32_0 : i32
    scf.if %2 {
      %cst_25 = arith.constant 0.000000e+00 : f32
      %c0_26 = arith.constant 0 : index
      %70 = memref.load %arg7[%c0_26] : memref<3xf32, #tpu.memory_space<smem>>
      memref.store %cst_25, %arg7[%c0_26] : memref<3xf32, #tpu.memory_space<smem>>
      %cst_27 = arith.constant 0.000000e+00 : f32
      %c1_28 = arith.constant 1 : index
      %71 = memref.load %arg7[%c1_28] : memref<3xf32, #tpu.memory_space<smem>>
      memref.store %cst_27, %arg7[%c1_28] : memref<3xf32, #tpu.memory_space<smem>>
      %cst_29 = arith.constant 0.000000e+00 : f32
      %c2_30 = arith.constant 2 : index
      %72 = memref.load %arg7[%c2_30] : memref<3xf32, #tpu.memory_space<smem>>
      memref.store %cst_29, %arg7[%c2_30] : memref<3xf32, #tpu.memory_space<smem>>
    } else {
    }
    %c0 = arith.constant 0 : index
    %c0_1 = arith.constant 0 : index
    %3 = vector.load %arg3[%c0, %c0_1] : memref<16x2xi32, #tpu.memory_space<vmem>>, vector<16x2xi32>
    %c0_2 = arith.constant 0 : index
    %4 = memref.load %arg7[%c0_2] : memref<3xf32, #tpu.memory_space<smem>>
    %5 = vector.extract_strided_slice %3 {offsets = [0, 0], sizes = [16, 1], strides = [1, 1]} : vector<16x2xi32> to vector<16x1xi32>
    %c0_3 = arith.constant 0 : index
    %c0_4 = arith.constant 0 : index
    %6 = vector.load %arg1[%c0_3, %c0_4] : memref<16x16xf32, #tpu.memory_space<vmem>>, vector<16x16xf32>
    %cst = arith.constant dense<0xFF800000> : vector<16xf32>
    %7 = vector.multi_reduction <maximumf>, %6, %cst [1] : vector<16x16xf32> to vector<16xf32>
    %8 = vector.shape_cast %7 : vector<16xf32> to vector<16x1xf32>
    %9 = vector.broadcast %8 : vector<16x1xf32> to vector<16x16xf32>
    %10 = arith.subf %6, %9 : vector<16x16xf32>
    %11 = math.exp %10 : vector<16x16xf32>
    %cst_5 = arith.constant dense<0.000000e+00> : vector<16xf32>
    %12 = vector.multi_reduction <add>, %11, %cst_5 [1] : vector<16x16xf32> to vector<16xf32>
    %13 = vector.shape_cast %12 : vector<16xf32> to vector<16x1xf32>
    %14 = math.log %13 : vector<16x1xf32>
    %15 = arith.addf %14, %8 : vector<16x1xf32>
    %16 = tpu.iota {dimensions = array<i32: 1>} : vector<16x16xi32>
    %17 = vector.broadcast %5 : vector<16x1xi32> to vector<16x16xi32>
    %18 = arith.cmpi eq, %16, %17 : vector<16x16xi32>
    %cst_6 = arith.constant 0.000000e+00 : f32
    %19 = vector.broadcast %cst_6 : f32 to vector<16x16xf32>
    %20 = arith.select %18, %6, %19 : vector<16x16xi1>, vector<16x16xf32>
    %cst_7 = arith.constant dense<0.000000e+00> : vector<16xf32>
    %21 = vector.multi_reduction <add>, %20, %cst_7 [1] : vector<16x16xf32> to vector<16xf32>
    %22 = vector.shape_cast %21 : vector<16xf32> to vector<16x1xf32>
    %23 = arith.subf %15, %22 : vector<16x1xf32>
    %24 = vector.shape_cast %23 : vector<16x1xf32> to vector<1x16x1xf32>
    %cst_8 = arith.constant dense<0.000000e+00> : vector<1xf32>
    %25 = vector.multi_reduction <add>, %24, %cst_8 [1, 2] : vector<1x16x1xf32> to vector<1xf32>
    %26 = vector.shape_cast %25 : vector<1xf32> to vector<1x1x1xf32>
    %27 = vector.extract %26[0, 0, 0] : f32 from vector<1x1x1xf32>
    %28 = arith.addf %4, %27 : f32
    %c0_9 = arith.constant 0 : index
    %29 = memref.load %arg7[%c0_9] : memref<3xf32, #tpu.memory_space<smem>>
    memref.store %28, %arg7[%c0_9] : memref<3xf32, #tpu.memory_space<smem>>
    %c1 = arith.constant 1 : index
    %30 = memref.load %arg7[%c1] : memref<3xf32, #tpu.memory_space<smem>>
    %31 = vector.extract_strided_slice %3 {offsets = [0, 1], sizes = [16, 1], strides = [1, 1]} : vector<16x2xi32> to vector<16x1xi32>
    %c0_10 = arith.constant 0 : index
    %c0_11 = arith.constant 0 : index
    %32 = vector.load %arg2[%c0_10, %c0_11] : memref<16x8xf32, #tpu.memory_space<vmem>>, vector<16x8xf32>
    %cst_12 = arith.constant dense<0xFF800000> : vector<16xf32>
    %33 = vector.multi_reduction <maximumf>, %32, %cst_12 [1] : vector<16x8xf32> to vector<16xf32>
    %34 = vector.shape_cast %33 : vector<16xf32> to vector<16x1xf32>
    %35 = vector.broadcast %34 : vector<16x1xf32> to vector<16x8xf32>
    %36 = arith.subf %32, %35 : vector<16x8xf32>
    %37 = math.exp %36 : vector<16x8xf32>
    %cst_13 = arith.constant dense<0.000000e+00> : vector<16xf32>
    %38 = vector.multi_reduction <add>, %37, %cst_13 [1] : vector<16x8xf32> to vector<16xf32>
    %39 = vector.shape_cast %38 : vector<16xf32> to vector<16x1xf32>
    %40 = math.log %39 : vector<16x1xf32>
    %41 = arith.addf %40, %34 : vector<16x1xf32>
    %42 = tpu.iota {dimensions = array<i32: 1>} : vector<16x8xi32>
    %43 = vector.broadcast %31 : vector<16x1xi32> to vector<16x8xi32>
    %44 = arith.cmpi eq, %42, %43 : vector<16x8xi32>
    %cst_14 = arith.constant 0.000000e+00 : f32
    %45 = vector.broadcast %cst_14 : f32 to vector<16x8xf32>
    %46 = arith.select %44, %32, %45 : vector<16x8xi1>, vector<16x8xf32>
    %cst_15 = arith.constant dense<0.000000e+00> : vector<16xf32>
    %47 = vector.multi_reduction <add>, %46, %cst_15 [1] : vector<16x8xf32> to vector<16xf32>
    %48 = vector.shape_cast %47 : vector<16xf32> to vector<16x1xf32>
    %49 = arith.subf %41, %48 : vector<16x1xf32>
    %50 = vector.shape_cast %49 : vector<16x1xf32> to vector<1x16x1xf32>
    %cst_16 = arith.constant dense<0.000000e+00> : vector<1xf32>
    %51 = vector.multi_reduction <add>, %50, %cst_16 [1, 2] : vector<1x16x1xf32> to vector<1xf32>
    %52 = vector.shape_cast %51 : vector<1xf32> to vector<1x1x1xf32>
    %53 = vector.extract %52[0, 0, 0] : f32 from vector<1x1x1xf32>
    %54 = arith.addf %30, %53 : f32
    %c1_17 = arith.constant 1 : index
    %55 = memref.load %arg7[%c1_17] : memref<3xf32, #tpu.memory_space<smem>>
    memref.store %54, %arg7[%c1_17] : memref<3xf32, #tpu.memory_space<smem>>
    %c0_18 = arith.constant 0 : index
    %c0_19 = arith.constant 0 : index
    %56 = vector.load %arg4[%c0_18, %c0_19] : memref<16x16xf32, #tpu.memory_space<vmem>>, vector<16x16xf32>
    %c0_20 = arith.constant 0 : index
    %c0_21 = arith.constant 0 : index
    %57 = vector.load %arg5[%c0_20, %c0_21] : memref<16x16xf32, #tpu.memory_space<vmem>>, vector<16x16xf32>
    %58 = arith.subf %56, %57 : vector<16x16xf32>
    %c2 = arith.constant 2 : index
    %59 = memref.load %arg7[%c2] : memref<3xf32, #tpu.memory_space<smem>>
    %60 = arith.mulf %58, %58 : vector<16x16xf32>
    %61 = vector.shape_cast %60 : vector<16x16xf32> to vector<1x16x16xf32>
    %cst_22 = arith.constant dense<0.000000e+00> : vector<1xf32>
    %62 = vector.multi_reduction <add>, %61, %cst_22 [1, 2] : vector<1x16x16xf32> to vector<1xf32>
    %63 = vector.shape_cast %62 : vector<1xf32> to vector<1x1x1xf32>
    %64 = vector.extract %63[0, 0, 0] : f32 from vector<1x1x1xf32>
    %65 = arith.addf %59, %64 : f32
    %c2_23 = arith.constant 2 : index
    %66 = memref.load %arg7[%c2_23] : memref<3xf32, #tpu.memory_space<smem>>
    memref.store %65, %arg7[%c2_23] : memref<3xf32, #tpu.memory_space<smem>>
    %c3_i32 = arith.constant 3 : i32
    %67 = arith.cmpi eq, %arg0, %c3_i32 : i32
    %68 = arith.extui %67 : i1 to i32
    %c0_i32_24 = arith.constant 0 : i32
    %69 = arith.cmpi ne, %68, %c0_i32_24 : i32
    scf.if %69 {
      %c0_25 = arith.constant 0 : index
      %70 = memref.load %arg7[%c0_25] : memref<3xf32, #tpu.memory_space<smem>>
      %cst_26 = arith.constant 0.699999988 : f32
      %71 = arith.mulf %cst_26, %70 : f32
      %cst_27 = arith.constant 1.562500e-02 : f32
      %72 = arith.mulf %71, %cst_27 : f32
      %c1_28 = arith.constant 1 : index
      %73 = memref.load %arg7[%c1_28] : memref<3xf32, #tpu.memory_space<smem>>
      %cst_29 = arith.constant 1.300000e+00 : f32
      %74 = arith.mulf %cst_29, %73 : f32
      %cst_30 = arith.constant 1.562500e-02 : f32
      %75 = arith.mulf %74, %cst_30 : f32
      %76 = arith.addf %72, %75 : f32
      %c2_31 = arith.constant 2 : index
      %77 = memref.load %arg7[%c2_31] : memref<3xf32, #tpu.memory_space<smem>>
      %cst_32 = arith.constant 2.000000e+00 : f32
      %78 = arith.mulf %cst_32, %77 : f32
      %cst_33 = arith.constant 9.765625E-4 : f32
      %79 = arith.mulf %78, %cst_33 : f32
      %80 = arith.addf %76, %79 : f32
      %c0_34 = arith.constant 0 : index
      %81 = memref.load %arg6[%c0_34] : memref<1xf32, #tpu.memory_space<smem>>
      memref.store %80, %arg6[%c0_34] : memref<1xf32, #tpu.memory_space<smem>>
    } else {
    }
    return
  }
  func.func @transform_0(%arg0: i32) -> (i32, i32) {
    %c0_i32 = arith.constant 0 : i32
    %c0_i32_0 = arith.constant 0 : i32
    return %arg0, %c0_i32 : i32, i32
  }
  func.func @transform_1(%arg0: i32) -> (i32, i32) {
    %c0_i32 = arith.constant 0 : i32
    %c0_i32_0 = arith.constant 0 : i32
    return %arg0, %c0_i32 : i32, i32
  }
  func.func @transform_2(%arg0: i32) -> (i32, i32) {
    %c0_i32 = arith.constant 0 : i32
    %c0_i32_0 = arith.constant 0 : i32
    return %arg0, %c0_i32 : i32, i32
  }
  func.func @transform_3(%arg0: i32) -> (i32, i32) {
    %c0_i32 = arith.constant 0 : i32
    %c0_i32_0 = arith.constant 0 : i32
    return %arg0, %c0_i32 : i32, i32
  }
  func.func @transform_4(%arg0: i32) -> (i32, i32) {
    %c0_i32 = arith.constant 0 : i32
    %c0_i32_0 = arith.constant 0 : i32
    return %arg0, %c0_i32 : i32, i32
  }
  func.func @transform_5(%arg0: i32) -> i32 {
    %c0_i32 = arith.constant 0 : i32
    %c0_i32_0 = arith.constant 0 : i32
    return %c0_i32 : i32
  }
}

</mosaic_0001>

<bundles_post_ra>
// kernel: tpu_custom_call.1
= control target key start
LH: loop header
LB: loop body
LE: loop exit
PB: predicated region body
PF: predicated region fallthrough
CT: control target
= control target key end

     0   :  { %10 = vsyncpa [#allocation4], 0  ;;  %s706_s18 = smov 0   ;;  %s801_s0 = inlined_call_operand.vmem [shape: f32[64,16], index: 0, kind: input, shape index: {}]   ;;  %s802_s1 = inlined_call_operand.vmem [shape: f32[64,8], index: 1, kind: input, shape index: {}]   ;;  %s803_s2 = inlined_call_operand.vmem [shape: s32[64,2], index: 2, kind: input, shape index: {}]   ;;  %s804_s3 = inlined_call_operand.vmem [shape: f32[64,16], index: 3, kind: input, shape index: {}]   ;;  %s805_s4 = inlined_call_operand.vmem [shape: f32[64,16], index: 4, kind: input, shape index: {}]   ;;  %s806_s5 = inlined_call_operand.hbm [shape: f32[1], index: 5, kind: output, shape index: {}]  }
   0x1 LB: > { %s712_s19 = sadd.s32 4294967295, %s670_s18   ;;  %p575_p0 = scmp.ge.s32.totalorder %s670_s18, 1  ;;  %s670_s18 = sphi %s706_s18, %s16_s18  }
   0x2   : > { %p228_p1 = scmp.lt.s32.totalorder %s670_s18, 5 }
   0x4   : > { %p229_p2 = pnand %p575_p0, %p228_p1 }
   0x5   : > { %s576_s20 = sshll.u32 (!%p229_p2), %s712_s19, 1  ;;  %v672_v0 = vmov (!%p229_p2), 0   ;;  %vm316_vm0 = vcmask (!%p229_p2), 130048   ;;  %vm380_vm1 = vcmask (!%p229_p2), 64512   ;;  %v673_v11 = vmov (!%p229_p2), 1   ;;  %p612_p4 = scmp.eq.s32.totalorder (!%p229_p2), %s712_s19, 0 }
   0x6   : > { %232 = sbr.rel (%p229_p2) target bundleno = 568 (0x238), region = 40  ;;  %p272_p3 = scmp.lt.s32.totalorder (!%p229_p2), %s576_s20, 7  ;;  %629 = vset.pattern.permute.xlu1 (!%p229_p2), %v672_v0  ;;  %628 = vset.pattern.permute.xlu0 (!%p229_p2), %v672_v0  ;;  %v341_v25 = vlaneseq (!%p229_p2)  ;;  %vm361_vm6 = vcmask (!%p229_p2), 7168  }
   0x7   : > { %s674_s12 = smov (!%p229_p2), 0.0   ;;  %p613_p5 = scmp.eq.s32.totalorder (!%p229_p2), %s712_s19, 3 }
   0x8   : > { %v342_v26 = vand.u32 (!%p229_p2), 127, %v341_v25  ;;  %s648_s9 = scalar_lea.hbm (!%p229_p2), %s806_s5, 16 }
   0x9   : > { %p649_p6 = scmp.ne.s32.totalorder (!%p229_p2), %s806_s5, %s648_s9  ;;  %p654_p9 = scmp.lt.u32.totalorder (!%p229_p2), %s648_s9, %s806_s5 }
   0xb   : > { %p650_p7 = pnand (!%p229_p2), %p649_p6, %p613_p5 }
   0xd   : > { %s808_s20 = smov (!%p272_p3, %s576_s20), 7  ;;  %603 = sst [smem:[#allocation2]] (%p612_p4), %s674_s12 }
   0xe   : > { %s717_s21 = sshll.u32 %s808_s20, 3  ;;  %604 = sst [smem:[#allocation2 + $0x1]] (%p612_p4), %s674_s12 }
   0xf   : > { %s275_s24 = scalar_lea.vmem %s801_s0, %s717_s21  ;;  %s281_s27 = scalar_lea.vmem %s802_s1, %s717_s21 }
  0x10   : > { %v314_v1 = vld [vmem:[%s275_s24] sm:$0xff]  ;;  %v727_v3 = vld [vmem:[%s275_s24 + $0x8] sm:$0xff]  ;;  %s287_s30 = scalar_lea.vmem %s803_s2, %s717_s21  ;;  %s293_s8 = scalar_lea.vmem %s804_s3, %s717_s21 }
  0x11   : > { %v378_v2 = vld [vmem:[%s281_s27] sm:$0xff]  ;;  %v317_v4 = vsel %vm316_vm0, %v314_v1, -inf  ;;  %v379_v6 = vld [vmem:[%s281_s27 + $0x8] sm:$0xff]  ;;  %v320_v7 = vsel %vm316_vm0, %v727_v3, -inf  ;;  %s299_s11 = scalar_lea.vmem %s805_s4, %s717_s21  ;;  %605 = sst [smem:[#allocation2 + $0x2]] (%p612_p4), %s674_s12 }
  0x12   : > { %v381_v5 = vsel %vm380_vm1, %v378_v2, -inf  ;;  %318 = vmax.xlane.f32.xlu0 %v317_v4  ;;  %v384_v8 = vsel %vm380_vm1, %v379_v6, -inf  ;;  %v312_v9 = vld [vmem:[%s287_s30 + $0x8] sm:$0xff]  ;;  %v311_v10 = vld [vmem:[%s287_s30] sm:$0xff]  ;;  %s313_s13 = sld [smem:[#allocation2]]  ;;  %s587_s14 = sld [smem:[#allocation2 + $0x1]] }
  0x13   : > { %382 = vmax.xlane.f32.xlu1 %v381_v5  ;;  %v438_v51 = vld [vmem:[%s293_s8] sm:$0xff]  ;;  %v439_v54 = vld [vmem:[%s293_s8 + $0x8] sm:$0xff]  ;;  %s588_s16 = sld [smem:[#allocation2 + $0x2]]  ;;  %p651_p8 = pneg %p650_p7 }
  0x14   : > { %v440_v55 = vld [vmem:[%s299_s11] sm:$0xff]  ;;  %v441_v56 = vld [vmem:[%s299_s11 + $0x8] sm:$0xff] }
  0x15   : > { %v442_v59 = vsub.f32 %v438_v51, %v440_v55  ;;  %v443_v60 = vsub.f32 %v439_v54, %v441_v56  ;;  %p656_p10 = pnand %p654_p9, %p651_p8 }
  0x16   : > { %321 = vmax.xlane.f32.xlu0 %v320_v7 }
  0x17   : > { %385 = vmax.xlane.f32.xlu1 %v384_v8  ;;  %v446_v7 = vmul.f32 %v443_v60, %v443_v60 }
  0x28   : > { %347 = vperm.xlu1 %629, %v312_v9  }
  0x2c   : > { %630 = vset.pattern.permute.xlu1 %v673_v11  ;;  %344 = vperm.xlu0 %628, %v311_v10  }
  0x2d   : > { %406 = vperm.xlu1 %630, %v311_v10  }
  0x30   : > { %631 = vset.pattern.permute.xlu0 %v673_v11 }
  0x31   : > { %409 = vperm.xlu1 %630, %v312_v9  }
  0x9f   : > { %v738_v12 = vpop.xlane.xlu0 %318 }
  0xa0   : > { %v740_v13 = vpop.xlane.xlu1 %382  ;;  %v323_v14 = vsub.f32 %v314_v1, %v738_v12 }
  0xa1   : > { %v387_v15 = vsub.f32 %v378_v2, %v740_v13 }
  0xa2   : > { %v325_v16 = vmul.f32 1.442695, %v323_v14 }
  0xa3   : > { %v389_v17 = vmul.f32 1.442695, %v387_v15  ;;  %v744_v18 = vpop.xlane.xlu0 %321 }
  0xa4   : > { %v746_v19 = vpop.xlane.xlu1 %385  ;;  %632 = vpow2.f32 %v325_v16  ;;  %v324_v20 = vsub.f32 %v727_v3, %v744_v18 }
  0xa5   : > { %v388_v21 = vsub.f32 %v379_v6, %v746_v19  ;;  %634 = vpow2.f32 %v389_v17 }
  0xa6   : > { %v327_v22 = vmul.f32 1.442695, %v324_v20 }
  0xa7   : > { %v391_v23 = vmul.f32 1.442695, %v388_v21 }
  0xa8   : > { %636 = vpow2.f32 %v327_v22  ;;  %v348_v24 = vpop.permute.xlu1 %347 }
  0xa9   : > { %638 = vpow2.f32 %v391_v23  ;;  %vm350_vm4 = vcmp.eq.s32.totalorder %v342_v26, %v348_v24 }
  0xaa   : > { %v352_v42 = vsel %vm350_vm4, %v727_v3, 0.0 }
  0xab   : > { %v345_v31 = vpop.permute.xlu0 %344  ;;  %v356_v44 = vsel %vm316_vm0, %v352_v42, 0.0 }
  0xac   : > { %v407_v28 = vpop.permute.xlu1 %406  ;;  %vm349_vm3 = vcmp.eq.s32.totalorder %v342_v26, %v345_v31 }
  0xad   : > { %vm411_vm2 = vcmp.eq.s32.totalorder %v342_v26, %v407_v28  ;;  %v351_v39 = vsel %vm349_vm3, %v314_v1, 0.0 }
  0xae   : > { %v633_v27 = vpop.eup %632  ;;  %v413_v34 = vsel %vm411_vm2, %v378_v2, 0.0  ;;  %v353_v41 = vsel %vm316_vm0, %v351_v39, 0.0 }
  0xaf   : > { %v635_v29 = vpop.eup %634  ;;  %v329_v30 = vsel %vm316_vm0, %v633_v27, 0.0  ;;  %v415_v38 = vsel %vm380_vm1, %v413_v34, 0.0 }
  0xb0   : > { %330 = vadd.xlane.f32.xlu1 %v329_v30  ;;  %v393_v32 = vsel %vm380_vm1, %v635_v29, 0.0  ;;  %v410_v40 = vpop.permute.xlu1 %409 }
  0xb1   : > { %vm412_vm5 = vcmp.eq.s32.totalorder %v342_v26, %v410_v40 }
  0xb2   : > { %v637_v33 = vpop.eup %636  ;;  %v414_v43 = vsel %vm412_vm5, %v379_v6, 0.0  ;;  %v445_v6 = vmul.f32 %v442_v59, %v442_v59 }
  0xb3   : > { %v639_v35 = vpop.eup %638  ;;  %v332_v36 = vsel %vm316_vm0, %v637_v33, 0.0  ;;  %v418_v45 = vsel %vm380_vm1, %v414_v43, 0.0 }
  0xb4   : > { %394 = vadd.xlane.f32.xlu1 %v393_v32  ;;  %333 = vadd.xlane.f32.xlu0 %v332_v36  ;;  %v396_v37 = vsel %vm380_vm1, %v639_v35, 0.0  ;;  %v447_v16 = vsel %vm316_vm0, %v445_v6, 0.0 }
  0xb8   : > { %397 = vadd.xlane.f32.xlu1 %v396_v37  ;;  %416 = vadd.xlane.f32.xlu0 %v415_v38 }
  0xbc   : > { %354 = vadd.xlane.f32.xlu1 %v353_v41 }
  0xc0   : > { %357 = vadd.xlane.f32.xlu1 %v356_v44 }
  0xc4   : > { %419 = vadd.xlane.f32.xlu1 %v418_v45 }
 0x13d   : > { %v331_v46 = vpop.xlane.xlu1 %330 }
 0x13e   : > { %640 = vlog2.f32 %v331_v46 }
 0x141   : > { %v395_v47 = vpop.xlane.xlu1 %394  ;;  %v334_v48 = vpop.xlane.xlu0 %333 }
 0x142   : > { %642 = vlog2.f32 %v395_v47 }
 0x143   : > { %644 = vlog2.f32 %v334_v48 }
 0x145   : > { %v398_v49 = vpop.xlane.xlu1 %397  ;;  %v417_v5 = vpop.xlane.xlu0 %416 }
 0x146   : > { %646 = vlog2.f32 %v398_v49 }
 0x148   : > { %v641_v50 = vpop.eup %640 }
 0x149   : > { %v336_v52 = vmul.f32 0.6931472, %v641_v50  ;;  %v355_v53 = vpop.xlane.xlu1 %354 }
 0x14b   : > { %v339_v58 = vadd.f32 %v336_v52, %v738_v12 }
 0x14c   : > { %v643_v57 = vpop.eup %642 }
 0x14d   : > { %v645_v61 = vpop.eup %644  ;;  %v400_v62 = vmul.f32 0.6931472, %v643_v57  ;;  %v358_v0 = vpop.xlane.xlu1 %357  ;;  %v359_v3 = vsub.f32 %v339_v58, %v355_v53 }
 0x14e   : > { %v338_v63 = vmul.f32 0.6931472, %v645_v61 }
 0x14f   : > { %v403_v1 = vadd.f32 %v400_v62, %v740_v13  ;;  %v362_v14 = vsel %vm361_vm6, %v359_v3, 0.0  ;;  %v448_v13 = vsel %vm316_vm0, %v446_v7, 0.0 }
 0x150   : > { %v647_v2 = vpop.eup %646  ;;  %v340_v4 = vadd.f32 %v338_v63, %v744_v18  ;;  %v449_v18 = vadd.f32 %v448_v13, %v447_v16 }
 0x151   : > { %v402_v8 = vmul.f32 0.6931472, %v647_v2  ;;  %v421_v10 = vsub.f32 %v403_v1, %v417_v5  ;;  %v420_v12 = vpop.xlane.xlu1 %419 }
 0x152   : > { %v360_v9 = vsub.f32 %v340_v4, %v358_v0 }
 0x153   : > { %v404_v11 = vadd.f32 %v402_v8, %v746_v19  ;;  %v423_v21 = vsel %vm361_vm6, %v421_v10, 0.0 }
 0x154   : > { %v363_v15 = vsel %vm361_vm6, %v360_v9, 0.0 }
 0x155   : > { %v422_v17 = vsub.f32 %v404_v11, %v420_v12  ;;  %v364_v20 = vadd.f32 %v363_v15, %v362_v14 }
 0x157   : > { %365 = vadd.xlane.f32.xlu0 %v364_v20  ;;  %v424_v22 = vsel %vm361_vm6, %v422_v17, 0.0 }
 0x158   : > { %v425_v23 = vadd.f32 %v424_v22, %v423_v21 }
 0x15a   : > { %426 = vadd.xlane.f32.xlu1 %v425_v23 }
 0x15b   : > { %450 = vadd.xlane.f32.xlu0 %v449_v18 }
 0x1e4   : > { %v366_v19 = vpop.xlane.xlu0 %365 }
 0x1e5   : > { %v367_v24 = vrot.slane %v366_v19, 4 }
 0x1e7   : > { %v368_v25 = vadd.f32 %v367_v24, %v366_v19  ;;  %v427_v26 = vpop.xlane.xlu1 %426 }
 0x1e8   : > { %v428_v27 = vrot.slane %v427_v26, 4  ;;  %v451_v28 = vpop.xlane.xlu0 %450 }
 0x1e9   : > { %v369_v29 = vrot.slane %v368_v25, 2  ;;  %v452_v30 = vrot.slane %v451_v28, 4 }
 0x1ea   : > { %v429_v31 = vadd.f32 %v428_v27, %v427_v26 }
 0x1eb   : > { %v453_v32 = vadd.f32 %v452_v30, %v451_v28  ;;  %v370_v33 = vadd.f32 %v369_v29, %v368_v25 }
 0x1ec   : > { %v430_v34 = vrot.slane %v429_v31, 2 }
 0x1ed   : > { %v454_v35 = vrot.slane %v453_v32, 2  ;;  %v371_v36 = vrot.slane %v370_v33, 1 }
 0x1ee   : > { %v431_v37 = vadd.f32 %v430_v34, %v429_v31 }
 0x1ef   : > { %v455_v38 = vadd.f32 %v454_v35, %v453_v32  ;;  %v372_v39 = vadd.f32 %v371_v36, %v370_v33 }
 0x1f0   : > { %v432_v40 = vrot.slane %v431_v37, 1 }
 0x1f1   : > { %596 = vpush %v372_v39  ;;  %v456_v41 = vrot.slane %v455_v38, 1 }
 0x1f2   : > { %v433_v42 = vadd.f32 %v432_v40, %v431_v37 }
 0x1f3   : > { %v457_v43 = vadd.f32 %v456_v41, %v455_v38 }
 0x1f4   : > { %598 = vpush %v433_v42 }
 0x1f5   : > { %600 = vpush %v457_v43 }
 0x222   : > { %s597_s15 = spop %596 }
 0x223   : > { %s374_s17 = sadd.f32 %s597_s15, %s313_s13 }
 0x225   : > { %376 = sst [smem:[#allocation2]] %s374_s17  ;;  %s467_s20 = smul.f32 0.7, %s374_s17 }
 0x226   : > { %s599_s21 = spop %598 }
 0x227   : > { %s435_s22 = sadd.f32 %s599_s21, %s587_s14  ;;  %s601_s23 = spop %600 }
 0x228   : > { %s468_s25 = smul.f32 0.015625, %s467_s20  ;;  %s459_s26 = sadd.f32 %s601_s23, %s588_s16 }
 0x229   : > { %437 = sst [smem:[#allocation2 + $0x1]] %s435_s22  ;;  %s470_s24 = smul.f32 1.3, %s435_s22 }
 0x22a   : > { %461 = sst [smem:[#allocation2 + $0x2]] %s459_s26  ;;  %s474_s28 = smul.f32 2.0, %s459_s26 }
 0x22b   : > { %s471_s27 = smul.f32 0.015625, %s470_s24 }
 0x22c   : > { %s475_s30 = smul.f32 0.0009765625, %s474_s28 }
 0x22d   : > { %s472_s29 = sadd.f32 %s471_s27, %s468_s25 }
 0x22f   : > { %s476_s6 = sadd.f32 %s475_s30, %s472_s29 }
 0x231   : > { %607 = sst [smem:[#allocation3]] (%p613_p5), %s476_s6 }
 0x232   : > { %659 = shalt.err (!%p656_p10)
}
 0x233   : > { %s675_s14 = smov [#allocation3]  }
 0x234   : > { %609 = dma.smem_to_hbm (%p613_p5), %s675_s14, 16, %s806_s5, [#allocation4]  }
 0x235   : > { %665 = dma.done.wait (%p613_p5), [#allocation4], 16  }
 0x236   : > { %667 = vsyncadd (%p613_p5), [#allocation4], 4294967280 }
 0x237   : > { %492 = sfence }
 0x238 PF: > { %s16_s18 = sadd.s32 1, %s670_s18  }
 0x239   : > { %p13_p11 = scmp.ge.s32.totalorder %s16_s18, 6  }
 0x23b   :  { %15 = sbr.rel (!%p13_p11) target bundleno = 1 (0x1), region = 94 }
 0x242   :  { %498 = vsyncpa [#allocation4], 1 }
 0x243   :  { %500 = vsyncpa [#allocation4 + $0x1], 1 }

</bundles_post_ra>
